<compile_context>
chip_gen: v7x
topology: tpu7x:2x2x1
jax: 0.10.0
libtpu: 0.0.40
codegen_flags: <defaults>
</compile_context>

<pallas_src>
import jax
import jax.numpy as jnp
from jax.experimental import pallas as pl
from jax.experimental.pallas import tpu as pltpu

N_DIR_DIMS = 3
SH_DIMS = 16            # degree-4 spherical harmonics
FEAT_DIM = 16           # config.input_feature_dim
IN_DIM = FEAT_DIM + SH_DIMS   # 32
HIDDEN = 64
OUT_DIM = 3
OUT_PAD = 8             # output rows padded to one full sublane group
TM_MAX = 8192           # max points per tile (lane-dense dimension)
MIN_GRID_STEPS = 4      # keep the grid >= 4 steps (v7x: 2 TCs + pipelining)

SH_C0 = 0.28209479177387814   # SH band-0 constant (folded into b0 host-side)


def volume_radiance_kernel(featT_ref, dirsT_ref,
                           w0_ref, b0_ref,
                           w1_ref, b1_ref,
                           w2_ref, b2_ref,
                           out_ref):
    # dirs = (dirs + 1) / 2 followed by the SH remap 2*x - 1 is an exact
    # identity, so use the raw (unit) directions directly.
    d = dirsT_ref[...]                       # (3, TM) f32, lane-dense in points
    x = d[0:1, :]
    y = d[1:2, :]
    z = d[2:3, :]
    x2, y2, z2 = x * x, y * y, z * z
    xy, yz, xz = x * y, y * z, x * z

    # Degree-4 spherical harmonics built as a value via axis-0 concatenation
    # (sublane packing on the XLU; no VMEM scratch round-trip). Band 0 is a
    # constant and was folded into b0 host-side, so its row is zero here.
    sh = jnp.concatenate([
        jnp.zeros_like(x),
        -0.48860251190291987 * y,
        0.48860251190291987 * z,
        -0.48860251190291987 * x,
        1.0925484305920792 * xy,
        -1.0925484305920792 * yz,
        0.94617469575755997 * z2 - 0.31539156525251999,
        -1.0925484305920792 * xz,
        0.54627421529603959 * (x2 - y2),
        0.59004358992664352 * y * (-3.0 * x2 + y2),
        2.8906114426405538 * xy * z,
        0.45704579946446572 * y * (1.0 - 5.0 * z2),
        0.3731763325901154 * z * (5.0 * z2 - 3.0),
        0.45704579946446572 * x * (1.0 - 5.0 * z2),
        1.4453057213202769 * z * (x2 - y2),
        0.59004358992664352 * x * (-x2 + 3.0 * y2),
    ], axis=0).astype(jnp.bfloat16)                        # (16, TM)

    # Layer 0 as a single K=32 dot: inp^T = [feat^T ; sh^T]  (bf16, f32 acc).
    inp = jnp.concatenate([featT_ref[...], sh], axis=0)    # (32, TM) bf16
    h = jnp.dot(w0_ref[...], inp, preferred_element_type=jnp.float32)
    h = jnp.maximum(h + b0_ref[...], 0.0).astype(jnp.bfloat16)          # (64, TM)

    h = jnp.dot(w1_ref[...], h, preferred_element_type=jnp.float32) + b1_ref[...]
    h = jnp.maximum(h, 0.0).astype(jnp.bfloat16)                        # (64, TM)

    o = jnp.dot(w2_ref[...], h, preferred_element_type=jnp.float32) + b2_ref[...]
    out_ref[...] = jax.nn.sigmoid(o).astype(out_ref.dtype)              # (8, TM)


def _round_up(x, m):
    return ((x + m - 1) // m) * m


def _choose_tile(n):
    """Biggest lane-dense tile that still leaves >= MIN_GRID_STEPS grid steps."""
    tm = _round_up(max(1, (n + MIN_GRID_STEPS - 1) // MIN_GRID_STEPS), 128)
    return max(128, min(TM_MAX, tm))


def volume_radiance(features, dirs, params):
    """features: (N, FEAT_DIM) f32, dirs: (N, 3) f32  ->  (N, 3) f32."""
    N = features.shape[0]
    tm = _choose_tile(N)
    n_tot = _round_up(N, tm)
    n_pad = n_tot - N

    # ---- wrapper-side layout plumbing (channel-major, lane-dense along N) ----
    # Cast features to bf16 BEFORE transposing (halves transpose bytes).
    featT = jnp.pad(features.astype(jnp.bfloat16).T, ((0, 0), (0, n_pad)))   # (16, n_tot) bf16
    dirsT = jnp.pad(dirs.astype(jnp.float32).T, ((0, 0), (0, n_pad)))        # (3, n_tot)  f32

    w0, b0, w1, b1, w2, b2 = params
    # Fold the constant SH band-0 contribution into the layer-0 bias and zero
    # its weight row (kernel emits a zero SH row in its place).
    b0_fold = b0.reshape(-1) + SH_C0 * w0[FEAT_DIM, :]
    w0_mod = w0.at[FEAT_DIM, :].set(0.0)

    w0t = w0_mod.T.astype(jnp.bfloat16)                                  # (64, 32)
    w1t = w1.T.astype(jnp.bfloat16)                                      # (64, 64)
    w2t = jnp.zeros((OUT_PAD, HIDDEN), jnp.float32).at[:OUT_DIM].set(w2.T)
    w2t = w2t.astype(jnp.bfloat16)                                       # (8, 64), rows 3..7 zero
    b0t = b0_fold.reshape(HIDDEN, 1).astype(jnp.float32)
    b1t = b1.reshape(HIDDEN, 1).astype(jnp.float32)
    b2t = jnp.zeros((OUT_PAD, 1), jnp.float32).at[:OUT_DIM, 0].set(b2.reshape(-1))

    full2d = lambda shape: pl.BlockSpec(shape, lambda i: (0, 0))
    grid_spec = pltpu.PrefetchScalarGridSpec(
        num_scalar_prefetch=0,
        grid=(n_tot // tm,),
        in_specs=[
            pl.BlockSpec((FEAT_DIM, tm), lambda i: (0, i)),
            pl.BlockSpec((N_DIR_DIMS, tm), lambda i: (0, i)),
            full2d((HIDDEN, IN_DIM)),
            full2d((HIDDEN, 1)),
            full2d((HIDDEN, HIDDEN)),
            full2d((HIDDEN, 1)),
            full2d((OUT_PAD, HIDDEN)),
            full2d((OUT_PAD, 1)),
        ],
        out_specs=pl.BlockSpec((OUT_PAD, tm), lambda i: (0, i)),
    )

    flops = 2 * n_tot * (IN_DIM * HIDDEN + HIDDEN * HIDDEN + HIDDEN * OUT_PAD)
    bytes_accessed = n_tot * (FEAT_DIM * 2 + N_DIR_DIMS * 4 + OUT_PAD * 4)
    cost = pl.CostEstimate(flops=flops,
                           transcendentals=OUT_DIM * n_tot,
                           bytes_accessed=bytes_accessed)

    outT = pl.pallas_call(
        volume_radiance_kernel,
        out_shape=jax.ShapeDtypeStruct((OUT_PAD, n_tot), jnp.float32),
        grid_spec=grid_spec,
        compiler_params=pltpu.CompilerParams(
            dimension_semantics=("parallel",)),
        cost_estimate=cost,
    )(featT, dirsT, w0t, b0t, w1t, b1t, w2t, b2t)

    return outT[:OUT_DIM, :N].T                          # (N, 3) f32


def init_params(key):
    """Deterministic synthetic MLP parameters (VanillaMLP-style, with bias)."""
    n_in = FEAT_DIM + SH_DIMS
    k0, k1, k2 = jax.random.split(key, 3)
    w0 = jax.random.normal(k0, (n_in, HIDDEN), jnp.float32) * 0.1
    b0 = jnp.zeros((1, HIDDEN), jnp.float32)
    w1 = jax.random.normal(k1, (HIDDEN, HIDDEN), jnp.float32) * 0.1
    b1 = jnp.zeros((1, HIDDEN), jnp.float32)
    w2 = jax.random.normal(k2, (HIDDEN, OUT_DIM), jnp.float32) * 0.1
    b2 = jnp.zeros((1, OUT_DIM), jnp.float32)
    return (w0, b0, w1, b1, w2, b2)


def _sh_deg4_ref(d):
    """Reference degree-4 SH (column layout), d in [-1,1]^3, shape (N, 3)."""
    x, y, z = d[:, 0:1], d[:, 1:2], d[:, 2:3]
    x2, y2, z2 = x * x, y * y, z * z
    xy, yz, xz = x * y, y * z, x * z
    cols = [
        jnp.full_like(x, 0.28209479177387814),
        -0.48860251190291987 * y,
        0.48860251190291987 * z,
        -0.48860251190291987 * x,
        1.0925484305920792 * xy,
        -1.0925484305920792 * yz,
        0.94617469575755997 * z2 - 0.31539156525251999,
        -1.0925484305920792 * xz,
        0.54627421529603959 * (x2 - y2),
        0.59004358992664352 * y * (-3.0 * x2 + y2),
        2.8906114426405538 * xy * z,
        0.45704579946446572 * y * (1.0 - 5.0 * z2),
        0.3731763325901154 * z * (5.0 * z2 - 3.0),
        0.45704579946446572 * x * (1.0 - 5.0 * z2),
        1.4453057213202769 * z * (x2 - y2),
        0.59004358992664352 * x * (-x2 + 3.0 * y2),
    ]
    return jnp.concatenate(cols, axis=-1)


def _reference(features, dirs, params):
    """Plain-JAX f32 reference of the same forward pass."""
    w0, b0, w1, b1, w2, b2 = params
    d = 2.0 * ((dirs + 1.0) * 0.5) - 1.0          # identity, kept to match module
    sh = _sh_deg4_ref(d)
    inp = jnp.concatenate([features, sh], axis=-1)
    h = jnp.maximum(inp @ w0 + b0, 0.0)
    h = jnp.maximum(h @ w1 + b1, 0.0)
    return jax.nn.sigmoid(h @ w2 + b2)


if __name__ == "__main__":
    key = jax.random.PRNGKey(0)
    kf, kd, kp = jax.random.split(key, 3)

    N = 2000  # sample points (rays x samples, flattened); exercises tail padding
    features = jax.random.normal(kf, (N, FEAT_DIM), jnp.float32)
    dirs = jax.random.normal(kd, (N, N_DIR_DIMS), jnp.float32)
    dirs = dirs / jnp.linalg.norm(dirs, axis=-1, keepdims=True)  # unit directions

    params = init_params(kp)

    color = volume_radiance(features, dirs, params)
    color = jax.block_until_ready(color)

    ref = _reference(features, dirs, params)
    assert color.shape == (N, OUT_DIM) and color.dtype == jnp.float32
    # bf16 matmul operands with f32 accumulation -> loose-ish tolerance.
    assert jnp.max(jnp.abs(color - ref)) < 2e-2

    print("KERNEL_OK")
</pallas_src>

<mosaic_0001>
module attributes {stable_mosaic.version = 11 : i64} {
  func.func @volume_radiance_kernel(%arg0: i32, %arg1: memref<16x512xbf16, #tpu.memory_space<vmem>>, %arg2: memref<3x512xf32, #tpu.memory_space<vmem>>, %arg3: memref<64x32xbf16, #tpu.memory_space<vmem>>, %arg4: memref<64x1xf32, #tpu.memory_space<vmem>>, %arg5: memref<64x64xbf16, #tpu.memory_space<vmem>>, %arg6: memref<64x1xf32, #tpu.memory_space<vmem>>, %arg7: memref<8x64xbf16, #tpu.memory_space<vmem>>, %arg8: memref<8x1xf32, #tpu.memory_space<vmem>>, %arg9: memref<8x512xf32, #tpu.memory_space<vmem>>) attributes {dimension_semantics = [#tpu.dimension_semantics<parallel>], iteration_bounds = array<i64: 4>, scalar_prefetch = 0 : i64, scratch_operands = 0 : i64, tpu.core_type = #tpu.core_type<tc>, window_params = [{transform_indices = @transform_0, window_bounds = array<i64: 16, 512>}, {transform_indices = @transform_1, window_bounds = array<i64: 3, 512>}, {pipeline_mode = #tpu.pipeline_mode<synchronous>, transform_indices = @transform_2, window_bounds = array<i64: 64, 32>}, {pipeline_mode = #tpu.pipeline_mode<synchronous>, transform_indices = @transform_3, window_bounds = array<i64: 64, 1>}, {pipeline_mode = #tpu.pipeline_mode<synchronous>, transform_indices = @transform_4, window_bounds = array<i64: 64, 64>}, {pipeline_mode = #tpu.pipeline_mode<synchronous>, transform_indices = @transform_5, window_bounds = array<i64: 64, 1>}, {pipeline_mode = #tpu.pipeline_mode<synchronous>, transform_indices = @transform_6, window_bounds = array<i64: 8, 64>}, {pipeline_mode = #tpu.pipeline_mode<synchronous>, transform_indices = @transform_7, window_bounds = array<i64: 8, 1>}, {transform_indices = @transform_8, window_bounds = array<i64: 8, 512>}]} {
    %c0 = arith.constant 0 : index
    %c0_0 = arith.constant 0 : index
    %0 = vector.load %arg2[%c0, %c0_0] : memref<3x512xf32, #tpu.memory_space<vmem>>, vector<3x512xf32>
    %1 = vector.extract_strided_slice %0 {offsets = [0, 0], sizes = [1, 512], strides = [1, 1]} : vector<3x512xf32> to vector<1x512xf32>
    %2 = vector.extract_strided_slice %0 {offsets = [1, 0], sizes = [1, 512], strides = [1, 1]} : vector<3x512xf32> to vector<1x512xf32>
    %3 = vector.extract_strided_slice %0 {offsets = [2, 0], sizes = [1, 512], strides = [1, 1]} : vector<3x512xf32> to vector<1x512xf32>
    %4 = arith.mulf %1, %1 : vector<1x512xf32>
    %5 = arith.mulf %2, %2 : vector<1x512xf32>
    %6 = arith.mulf %3, %3 : vector<1x512xf32>
    %7 = arith.mulf %1, %2 : vector<1x512xf32>
    %8 = arith.mulf %2, %3 : vector<1x512xf32>
    %9 = arith.mulf %1, %3 : vector<1x512xf32>
    %cst = arith.constant 0.000000e+00 : f32
    %10 = vector.broadcast %cst : f32 to vector<1x512xf32>
    %cst_1 = arith.constant -0.488602519 : f32
    %11 = vector.broadcast %cst_1 : f32 to vector<1x512xf32>
    %12 = arith.mulf %11, %2 : vector<1x512xf32>
    %cst_2 = arith.constant 0.488602519 : f32
    %13 = vector.broadcast %cst_2 : f32 to vector<1x512xf32>
    %14 = arith.mulf %13, %3 : vector<1x512xf32>
    %cst_3 = arith.constant -0.488602519 : f32
    %15 = vector.broadcast %cst_3 : f32 to vector<1x512xf32>
    %16 = arith.mulf %15, %1 : vector<1x512xf32>
    %cst_4 = arith.constant 1.09254849 : f32
    %17 = vector.broadcast %cst_4 : f32 to vector<1x512xf32>
    %18 = arith.mulf %17, %7 : vector<1x512xf32>
    %cst_5 = arith.constant -1.09254849 : f32
    %19 = vector.broadcast %cst_5 : f32 to vector<1x512xf32>
    %20 = arith.mulf %19, %8 : vector<1x512xf32>
    %cst_6 = arith.constant 0.946174681 : f32
    %21 = vector.broadcast %cst_6 : f32 to vector<1x512xf32>
    %22 = arith.mulf %21, %6 : vector<1x512xf32>
    %cst_7 = arith.constant 0.31539157 : f32
    %23 = vector.broadcast %cst_7 : f32 to vector<1x512xf32>
    %24 = arith.subf %22, %23 : vector<1x512xf32>
    %cst_8 = arith.constant -1.09254849 : f32
    %25 = vector.broadcast %cst_8 : f32 to vector<1x512xf32>
    %26 = arith.mulf %25, %9 : vector<1x512xf32>
    %27 = arith.subf %4, %5 : vector<1x512xf32>
    %cst_9 = arith.constant 0.546274245 : f32
    %28 = vector.broadcast %cst_9 : f32 to vector<1x512xf32>
    %29 = arith.mulf %28, %27 : vector<1x512xf32>
    %cst_10 = arith.constant 0.590043604 : f32
    %30 = vector.broadcast %cst_10 : f32 to vector<1x512xf32>
    %31 = arith.mulf %30, %2 : vector<1x512xf32>
    %cst_11 = arith.constant -3.000000e+00 : f32
    %32 = vector.broadcast %cst_11 : f32 to vector<1x512xf32>
    %33 = arith.mulf %32, %4 : vector<1x512xf32>
    %34 = arith.addf %33, %5 : vector<1x512xf32>
    %35 = arith.mulf %31, %34 : vector<1x512xf32>
    %cst_12 = arith.constant 2.89061141 : f32
    %36 = vector.broadcast %cst_12 : f32 to vector<1x512xf32>
    %37 = arith.mulf %36, %7 : vector<1x512xf32>
    %38 = arith.mulf %37, %3 : vector<1x512xf32>
    %cst_13 = arith.constant 0.457045794 : f32
    %39 = vector.broadcast %cst_13 : f32 to vector<1x512xf32>
    %40 = arith.mulf %39, %2 : vector<1x512xf32>
    %cst_14 = arith.constant 5.000000e+00 : f32
    %41 = vector.broadcast %cst_14 : f32 to vector<1x512xf32>
    %42 = arith.mulf %41, %6 : vector<1x512xf32>
    %cst_15 = arith.constant 1.000000e+00 : f32
    %43 = vector.broadcast %cst_15 : f32 to vector<1x512xf32>
    %44 = arith.subf %43, %42 : vector<1x512xf32>
    %45 = arith.mulf %40, %44 : vector<1x512xf32>
    %cst_16 = arith.constant 0.373176336 : f32
    %46 = vector.broadcast %cst_16 : f32 to vector<1x512xf32>
    %47 = arith.mulf %46, %3 : vector<1x512xf32>
    %cst_17 = arith.constant 5.000000e+00 : f32
    %48 = vector.broadcast %cst_17 : f32 to vector<1x512xf32>
    %49 = arith.mulf %48, %6 : vector<1x512xf32>
    %cst_18 = arith.constant 3.000000e+00 : f32
    %50 = vector.broadcast %cst_18 : f32 to vector<1x512xf32>
    %51 = arith.subf %49, %50 : vector<1x512xf32>
    %52 = arith.mulf %47, %51 : vector<1x512xf32>
    %cst_19 = arith.constant 0.457045794 : f32
    %53 = vector.broadcast %cst_19 : f32 to vector<1x512xf32>
    %54 = arith.mulf %53, %1 : vector<1x512xf32>
    %cst_20 = arith.constant 5.000000e+00 : f32
    %55 = vector.broadcast %cst_20 : f32 to vector<1x512xf32>
    %56 = arith.mulf %55, %6 : vector<1x512xf32>
    %cst_21 = arith.constant 1.000000e+00 : f32
    %57 = vector.broadcast %cst_21 : f32 to vector<1x512xf32>
    %58 = arith.subf %57, %56 : vector<1x512xf32>
    %59 = arith.mulf %54, %58 : vector<1x512xf32>
    %cst_22 = arith.constant 1.44530571 : f32
    %60 = vector.broadcast %cst_22 : f32 to vector<1x512xf32>
    %61 = arith.mulf %60, %3 : vector<1x512xf32>
    %62 = arith.subf %4, %5 : vector<1x512xf32>
    %63 = arith.mulf %61, %62 : vector<1x512xf32>
    %cst_23 = arith.constant 0.590043604 : f32
    %64 = vector.broadcast %cst_23 : f32 to vector<1x512xf32>
    %65 = arith.mulf %64, %1 : vector<1x512xf32>
    %cst_24 = arith.constant 0.000000e+00 : f32
    %66 = vector.broadcast %cst_24 : f32 to vector<1x512xf32>
    %67 = arith.subf %66, %4 : vector<1x512xf32>
    %cst_25 = arith.constant 3.000000e+00 : f32
    %68 = vector.broadcast %cst_25 : f32 to vector<1x512xf32>
    %69 = arith.mulf %68, %5 : vector<1x512xf32>
    %70 = arith.addf %67, %69 : vector<1x512xf32>
    %71 = arith.mulf %65, %70 : vector<1x512xf32>
    %72 = tpu.concatenate %10, %12, %14, %16, %18, %20, %24, %26, %29, %35, %38, %45, %52, %59, %63, %71 in 0 : vector<1x512xf32>, vector<1x512xf32>, vector<1x512xf32>, vector<1x512xf32>, vector<1x512xf32>, vector<1x512xf32>, vector<1x512xf32>, vector<1x512xf32>, vector<1x512xf32>, vector<1x512xf32>, vector<1x512xf32>, vector<1x512xf32>, vector<1x512xf32>, vector<1x512xf32>, vector<1x512xf32>, vector<1x512xf32> -> vector<16x512xf32>
    %73 = arith.truncf %72 : vector<16x512xf32> to vector<16x512xbf16>
    %c0_26 = arith.constant 0 : index
    %c0_27 = arith.constant 0 : index
    %74 = vector.load %arg1[%c0_26, %c0_27] : memref<16x512xbf16, #tpu.memory_space<vmem>>, vector<16x512xbf16>
    %75 = tpu.concatenate %74, %73 in 0 : vector<16x512xbf16>, vector<16x512xbf16> -> vector<32x512xbf16>
    %c0_28 = arith.constant 0 : index
    %c0_29 = arith.constant 0 : index
    %76 = vector.load %arg3[%c0_28, %c0_29] : memref<64x32xbf16, #tpu.memory_space<vmem>>, vector<64x32xbf16>
    %cst_30 = arith.constant dense<0.000000e+00> : vector<64x512xf32>
    %77 = tpu.matmul %76, %75, %cst_30 {dimension_numbers = #tpu.dot_dimension_numbers<[1], [0], [0], [1], [0, 0, 1, 1], [], []>} : vector<64x32xbf16>, vector<32x512xbf16>, vector<64x512xf32> -> vector<64x512xf32>
    %c0_31 = arith.constant 0 : index
    %c0_32 = arith.constant 0 : index
    %78 = vector.load %arg4[%c0_31, %c0_32] : memref<64x1xf32, #tpu.memory_space<vmem>>, vector<64x1xf32>
    %79 = vector.broadcast %78 : vector<64x1xf32> to vector<64x512xf32>
    %80 = arith.addf %77, %79 : vector<64x512xf32>
    %cst_33 = arith.constant 0.000000e+00 : f32
    %81 = vector.broadcast %cst_33 : f32 to vector<64x512xf32>
    %82 = arith.maximumf %80, %81 : vector<64x512xf32>
    %83 = arith.truncf %82 : vector<64x512xf32> to vector<64x512xbf16>
    %c0_34 = arith.constant 0 : index
    %c0_35 = arith.constant 0 : index
    %84 = vector.load %arg5[%c0_34, %c0_35] : memref<64x64xbf16, #tpu.memory_space<vmem>>, vector<64x64xbf16>
    %cst_36 = arith.constant dense<0.000000e+00> : vector<64x512xf32>
    %85 = tpu.matmul %84, %83, %cst_36 {dimension_numbers = #tpu.dot_dimension_numbers<[1], [0], [0], [1], [0, 0, 1, 1], [], []>} : vector<64x64xbf16>, vector<64x512xbf16>, vector<64x512xf32> -> vector<64x512xf32>
    %c0_37 = arith.constant 0 : index
    %c0_38 = arith.constant 0 : index
    %86 = vector.load %arg6[%c0_37, %c0_38] : memref<64x1xf32, #tpu.memory_space<vmem>>, vector<64x1xf32>
    %87 = vector.broadcast %86 : vector<64x1xf32> to vector<64x512xf32>
    %88 = arith.addf %85, %87 : vector<64x512xf32>
    %cst_39 = arith.constant 0.000000e+00 : f32
    %89 = vector.broadcast %cst_39 : f32 to vector<64x512xf32>
    %90 = arith.maximumf %88, %89 : vector<64x512xf32>
    %91 = arith.truncf %90 : vector<64x512xf32> to vector<64x512xbf16>
    %c0_40 = arith.constant 0 : index
    %c0_41 = arith.constant 0 : index
    %92 = vector.load %arg7[%c0_40, %c0_41] : memref<8x64xbf16, #tpu.memory_space<vmem>>, vector<8x64xbf16>
    %cst_42 = arith.constant dense<0.000000e+00> : vector<8x512xf32>
    %93 = tpu.matmul %92, %91, %cst_42 {dimension_numbers = #tpu.dot_dimension_numbers<[1], [0], [0], [1], [0, 0, 1, 1], [], []>} : vector<8x64xbf16>, vector<64x512xbf16>, vector<8x512xf32> -> vector<8x512xf32>
    %c0_43 = arith.constant 0 : index
    %c0_44 = arith.constant 0 : index
    %94 = vector.load %arg8[%c0_43, %c0_44] : memref<8x1xf32, #tpu.memory_space<vmem>>, vector<8x1xf32>
    %95 = vector.broadcast %94 : vector<8x1xf32> to vector<8x512xf32>
    %96 = arith.addf %93, %95 : vector<8x512xf32>
    %97 = arith.negf %96 : vector<8x512xf32>
    %98 = math.exp %97 : vector<8x512xf32>
    %cst_45 = arith.constant 1.000000e+00 : f32
    %99 = vector.broadcast %cst_45 : f32 to vector<8x512xf32>
    %100 = arith.addf %99, %98 : vector<8x512xf32>
    %101 = arith.divf %99, %100 : vector<8x512xf32>
    %c0_46 = arith.constant 0 : index
    %c0_47 = arith.constant 0 : index
    %102 = vector.load %arg9[%c0_46, %c0_47] : memref<8x512xf32, #tpu.memory_space<vmem>>, vector<8x512xf32>
    tpu.vector_store %arg9[%c0_46, %c0_47], %101 {strides = array<i32>} : memref<8x512xf32, #tpu.memory_space<vmem>>, vector<8x512xf32>,
    return
  }
  func.func @transform_0(%arg0: i32) -> (i32, i32) {
    %c0_i32 = arith.constant 0 : i32
    %c0_i32_0 = arith.constant 0 : i32
    return %c0_i32, %arg0 : i32, i32
  }
  func.func @transform_1(%arg0: i32) -> (i32, i32) {
    %c0_i32 = arith.constant 0 : i32
    %c0_i32_0 = arith.constant 0 : i32
    return %c0_i32, %arg0 : i32, i32
  }
  func.func @transform_2(%arg0: i32) -> (i32, i32) {
    %c0_i32 = arith.constant 0 : i32
    %c0_i32_0 = arith.constant 0 : i32
    %c0_i32_1 = arith.constant 0 : i32
    return %c0_i32, %c0_i32_0 : i32, i32
  }
  func.func @transform_3(%arg0: i32) -> (i32, i32) {
    %c0_i32 = arith.constant 0 : i32
    %c0_i32_0 = arith.constant 0 : i32
    %c0_i32_1 = arith.constant 0 : i32
    return %c0_i32, %c0_i32_0 : i32, i32
  }
  func.func @transform_4(%arg0: i32) -> (i32, i32) {
    %c0_i32 = arith.constant 0 : i32
    %c0_i32_0 = arith.constant 0 : i32
    %c0_i32_1 = arith.constant 0 : i32
    return %c0_i32, %c0_i32_0 : i32, i32
  }
  func.func @transform_5(%arg0: i32) -> (i32, i32) {
    %c0_i32 = arith.constant 0 : i32
    %c0_i32_0 = arith.constant 0 : i32
    %c0_i32_1 = arith.constant 0 : i32
    return %c0_i32, %c0_i32_0 : i32, i32
  }
  func.func @transform_6(%arg0: i32) -> (i32, i32) {
    %c0_i32 = arith.constant 0 : i32
    %c0_i32_0 = arith.constant 0 : i32
    %c0_i32_1 = arith.constant 0 : i32
    return %c0_i32, %c0_i32_0 : i32, i32
  }
  func.func @transform_7(%arg0: i32) -> (i32, i32) {
    %c0_i32 = arith.constant 0 : i32
    %c0_i32_0 = arith.constant 0 : i32
    %c0_i32_1 = arith.constant 0 : i32
    return %c0_i32, %c0_i32_0 : i32, i32
  }
  func.func @transform_8(%arg0: i32) -> (i32, i32) {
    %c0_i32 = arith.constant 0 : i32
    %c0_i32_0 = arith.constant 0 : i32
    return %c0_i32, %arg0 : i32, i32
  }
}

</mosaic_0001>

<bundles_post_ra>
// kernel: tpu_custom_call.1
= control target key start
LH: loop header
LB: loop body
LE: loop exit
PB: predicated region body
PF: predicated region fallthrough
CT: control target
= control target key end

     0   :  { %s2540_s0 = inlined_call_operand.vmem [shape: bf16[16,2048], index: 0, kind: input, shape index: {}]   ;;  %s2541_s1 = inlined_call_operand.hbm [shape: f32[3,2048], index: 1, kind: input, shape index: {}]   ;;  %s2542_s2 = inlined_call_operand.vmem [shape: bf16[64,32], index: 2, kind: input, shape index: {}]   ;;  %s2543_s3 = inlined_call_operand.vmem [shape: f32[64,1], index: 3, kind: input, shape index: {}]   ;;  %s2544_s4 = inlined_call_operand.vmem [shape: bf16[64,64], index: 4, kind: input, shape index: {}]   ;;  %s2545_s5 = inlined_call_operand.vmem [shape: f32[64,1], index: 5, kind: input, shape index: {}]   ;;  %s2546_s6 = inlined_call_operand.vmem [shape: bf16[8,64], index: 6, kind: input, shape index: {}]   ;;  %s2547_s7 = inlined_call_operand.vmem [shape: f32[8,1], index: 7, kind: input, shape index: {}]   ;;  %s2548_s8 = inlined_call_operand.hbm [shape: f32[8,2048], index: 8, kind: output, shape index: {}]  }
   0x1   :  { %2551 = sst [smem:[#allocation10_spill]] %s2540_s0 }
   0x2   :  { %13 = vsyncpa [#allocation4], 0 }
   0x3   :  { %15 = vsyncpa [#allocation4 + $0x1], 0 }
   0x4   :  { %16 = vsyncpa [#allocation5], 0 }
   0x5   :  { %18 = vsyncpa [#allocation5 + $0x1], 0  ;;  %s1987_s27 = smov 0   ;;  %s1989_s28 = smov 0  }
   0x6   :  { %s1991_s29 = smov 0   ;;  %s1993_s30 = smov 0  }
   0x7 LB: > { %s2008_s9 = sadd.s32 4294967295, %s1937_s30   ;;  %s1702_s10 = sadd.s32 4294967294, %s1937_s30   ;;  %s1937_s30 = sphi %s1993_s30, %s2565_s30   ;;  %s1933_s29 = sphi %s1991_s29, %s2564_s29   ;;  %s1929_s28 = sphi %s1989_s28, %s2563_s28   ;;  %s1925_s27 = sphi %s1987_s27, %s2562_s27  }
   0x8   : > { %s2012_s11 = sadd.s32 1, %s1937_s30   ;;  %s31_s12 = sadd.s32 1, %s1933_s29 }
   0x9   : > { %s28_s13 = ssub.s32 %s1937_s30, %s2012_s11  ;;  %p38_p0 = scmp.ne.s32.totalorder %s1933_s29, %s1929_s28 }
   0xa   : > { %p29_p1 = scmp.eq.s32.totalorder %s28_s13, 0  ;;  %p39_p2 = scmp.eq.s32.totalorder %s1937_s30, 0 }
   0xb   : > { %p70_p3 = scmp.ne.s32.totalorder %s1929_s28, %s1925_s27  ;;  %p71_p4 = scmp.eq.s32.totalorder %s2008_s9, 0 }
   0xc   : > { %s2024_s14 = scalar_select %p29_p1, %s1933_s29, %s31_s12  }
   0xd   : > { %p2026_p5 = por %p39_p2, %p38_p0  ;;  %p2030_p6 = por %p71_p4, %p70_p3 }
   0xe   : > { %2552 = sst [smem:[#allocation9_spill]] %s2024_s14  ;;  %p220_p7 = scmp.eq.s32.totalorder %s2008_s9, 3 }
   0xf   : > { %s2554_s16 = scalar_select %p2030_p6, 1, 0 }
  0x10   : > { %p226_p8 = scmp.eq.s32.totalorder %s1702_s10, 3  ;;  %p2035_p9 = por %p220_p7, %p38_p0 }
  0x11   : > { %p1704_p11 = scmp.ge.s32.totalorder %s1937_s30, 4 }
  0x12   : > { %s2555_s17 = scalar_select %p2035_p9, 1, 0 }
  0x13   : > { %p2039_p10 = por %p226_p8, %p70_p3  ;;  %260 = sbr.rel (%p1704_p11) target bundleno = 63 (0x3f), region = 40 }
  0x15   : > { %s2556_s18 = scalar_select %p2039_p10, 1, 0 }
  0x1a   : > { %263 = sbr.rel (!%p2026_p5) target bundleno = 38 (0x26), region = 44  ;;  %s265_s19 = sand.u32 (%p2026_p5), 1, %s1933_s29  }
  0x1b   : > { %s1766_s20 = sshll.u32 (%p2026_p5), %s1937_s30, 4  ;;  %s1705_s21 = sshll.u32 (%p2026_p5), %s265_s19, 5 }
  0x1c   : > { %s2557_s0 = sld [smem:[#allocation10_spill]] (%p2026_p5)  ;;  %s267_s25 = scalar_lea.vmem (%p2026_p5), [#allocation2], %s1705_s21 }
  0x22   : > { %s270_s24 = scalar_lea.vmem %s2557_s0, %s1766_s20 }
  0x23   : > { %v283_v0 = vld [vmem:[%s270_s24] sm:$0xff]  ;;  %v285_v1 = vld [vmem:[%s270_s24 + $0x8] sm:$0xff] }
  0x24   : > { %v287_v2 = vld [vmem:[%s270_s24 + $0x40] sm:$0xff]  ;;  %284 = vst [vmem:[%s267_s25] sm:$0xff] %v283_v0  ;;  %286 = vst [vmem:[%s267_s25 + $0x8] sm:$0xff] %v285_v1  ;;  %v289_v3 = vld [vmem:[%s270_s24 + $0x48] sm:$0xff] }
  0x25   : > { %288 = vst [vmem:[%s267_s25 + $0x10] sm:$0xff] %v287_v2  ;;  %290 = vst [vmem:[%s267_s25 + $0x18] sm:$0xff] %v289_v3 }
  0x26 PF: > { %s297_s26 = sand.u32 1, %s1933_s29   ;;  %s1767_s10 = sshll.u32 %s1937_s30, 8 }
  0x27   : > { %s1708_s12 = sshll.u32 %s297_s26, 4  ;;  %s2056_s20 = scalar_lea.hbm %s2541_s1, %s1767_s10 }
  0x28   : > { %s301_s21 = scalar_lea.vmem [#allocation3], %s1708_s12  ;;  %s298_s23 = scalar_lea.sflag [#allocation4], %s297_s26 }
  0x29   : > { %s309_s22 = sshll.u32 %s301_s21, 4  ;;  %s1843_s24 = scalar_lea.hbm %s2056_s20, 256  ;;  %s310_s22 = int_to_ptr.vmem [resolvable:$true] %s309_s22 }
  0x2a   : > { %p1844_p12 = scmp.ne.s32.totalorder %s2056_s20, %s1843_s24  ;;  %s1847_s14 = scalar_lea.hbm %s2541_s1, 1024 }
  0x2b   : > { %p1848_p1 = scmp.lt.u32.totalorder %s2056_s20, %s2541_s1  ;;  %p1849_p2 = scmp.lt.u32.totalorder %s1847_s14, %s1843_s24 }
  0x2c   : > { %p1845_p13 = pnand %p1844_p12, %p2026_p5  ;;  %p1851_p4 = scmp.lt.u32.totalorder %s1843_s24, %s2056_s20 }
  0x2d   : > { %p1850_p3 = por %p1849_p2, %p1848_p1 }
  0x2e   : > { %p1846_p0 = pneg %p1845_p13 }
  0x2f   : > { %p1852_p7 = por %p1851_p4, %p1850_p3 }
  0x31   : > { %p1853_p8 = pnand %p1852_p7, %p1846_p0 }
  0x33   : > { %1856 = shalt.err (!%p1853_p8)
}
  0x34   : > { %s1857_s26 = scalar_lea.vmem %s310_s22, 256  ;;  %s1939_s12 = smov [#allocation3]  }
  0x35   : > { %p1858_p11 = scmp.ne.s32.totalorder %s310_s22, %s1857_s26  ;;  %s1861_s19 = sshll.u32 %s1939_s12, 4  ;;  %s1862_s19 = int_to_ptr.vmem [resolvable:$false] %s1861_s19 }
  0x36   : > { %s1863_s0 = scalar_lea.vmem %s1862_s19, 512  ;;  %p1864_p10 = scmp.lt.s32.totalorder %s310_s22, %s1862_s19 }
  0x37   : > { %p1859_p12 = pnand %p1858_p11, %p2026_p5  ;;  %p1865_p9 = scmp.lt.s32.totalorder %s1863_s0, %s1857_s26 }
  0x39   : > { %p1860_p13 = pneg %p1859_p12  ;;  %p1866_p6 = por %p1865_p9, %p1864_p10 }
  0x3b   : > { %p1867_p1 = pnand %p1866_p6, %p1860_p13 }
  0x3d   : > { %1870 = shalt.err (!%p1867_p1)
}
  0x3e   : > { %1769 = dma.hbm_to_vmem [thread:$0]  (%p2026_p5), %s2056_s20, 256, %s310_s22, %s298_s23  }
  0x3f PF: > { %p1711_p0 = scmp.ge.s32.totalorder %s1937_s30, 1  ;;  %p314_p2 = scmp.lt.s32.totalorder %s1937_s30, 5 }
  0x41   : > { %p315_p3 = pnand %p1711_p0, %p314_p2 }
  0x42   : > { %s2078_s14 = sand.u32 (!%p315_p3), 1, %s1929_s28   ;;  %p2558_p5 = scmp.ne.s32.totalorder (!%p315_p3), %s2554_s16, 0 }
  0x43   : > { %318 = sbr.rel (%p315_p3) target bundleno = 892 (0x37c), region = 71  ;;  %s1712_s21 = sshll.u32 (!%p315_p3), %s2078_s14, 5 }
  0x44   : > { %s1713_s24 = sshll.u32 (!%p315_p3), %s2078_s14, 4  ;;  %s323_s15 = scalar_lea.vmem (!%p315_p3), [#allocation2], %s1712_s21 }
  0x45   : > { %s328_s20 = scalar_lea.sflag (!%p315_p3), [#allocation4], %s2078_s14  ;;  %s2085_s22 = scalar_lea.vmem (!%p315_p3), [#allocation3], %s1713_s24 }
  0x4a   : > { %1916 = dma.done.wait (%p2558_p5), %s328_s20, 256  }
  0x4b   : > { %1918 = vsyncadd (%p2558_p5), %s328_s20, 4294967040  ;;  %v496_v4 = vlaneseq  ;;  %v1940_v6 = vmov 0   ;;  %v1813_v8 = vld [vmem:[%s323_s15 + $0x4] ss:$16 sps:$4 sm:$0xff]   ;;  %v1815_v11 = vld [vmem:[%s323_s15 + $0xc] ss:$16 sps:$4 sm:$0xff]  }
  0x4c   : > { %1034 = vmatprep.mubr.bf16.mxu0 %v1940_v6  ;;  %1107 = vmatprep.mubr.bf16.mxu1 %v1940_v6  ;;  %v1817_v14 = vld [vmem:[%s323_s15] ss:$16 sps:$4 sm:$0xff]   ;;  %v1818_v15 = vld [vmem:[%s323_s15 + $0x8] ss:$16 sps:$4 sm:$0xff]   ;;  %vm822_vm0 = vcmask 1040384   ;;  %vm827_vm1 = vcmask 1041408  }
  0x4d   : > { %v497_v5 = vshrl.u32 %v496_v4, 7  ;;  %1811 = vset.pattern.permute.xlu0 %v1940_v6  ;;  %1812 = vset.pattern.permute.xlu1 %v1940_v6  ;;  %v372_v16 = vld [vmem:[%s2085_s22] sm:$0x77]  ;;  %v2117_v40 = vld [vmem:[%s2085_s22 + $0x8] sm:$0x77]  ;;  %vm832_vm2 = vcmask 1042432  }
  0x4e   : > { %1002 = vmatprep.subr.bf16.mxu0 %v1813_v8  ;;  %1075 = vmatprep.subr.bf16.mxu1 %v1815_v11  ;;  %v374_v17 = vmul.f32 %v372_v16, %v372_v16  ;;  %v1715_v18 = vrot.slane %v372_v16, 9  ;;  %v386_v19 = vrot.slane %v372_v16, 6  ;;  %v2106_v20 = vmul.f32 -0.48860252, %v372_v16  ;;  %v921_v58 = vld [vmem:[%s2543_s3] sm:$0xff]  ;;  %v923_v63 = vld [vmem:[%s2543_s3 + $0x10] sm:$0xff] }
  0x4f   : > { %v2095_v7 = vsub.s32 1, %v497_v5  ;;  %v2097_v9 = vsub.s32 5, %v497_v5  ;;  %v2099_v10 = vsub.s32 6, %v497_v5  ;;  %v2101_v12 = vsub.s32 0, %v497_v5  ;;  %1003 = vmatpush1.bf16.msra.mxu0 %v1817_v14  ;;  %1076 = vmatpush1.bf16.msra.mxu1 %v1818_v15  ;;  %v922_v4 = vld [vmem:[%s2543_s3 + $0x8] sm:$0xff]  ;;  %v924_v15 = vld [vmem:[%s2543_s3 + $0x18] sm:$0xff] }
  0x50   : > { %v2103_v13 = vsub.s32 4, %v497_v5  ;;  %v2108_v21 = vmul.f32 0.48860252, %v372_v16  ;;  %v420_v22 = vmul.f32 0.5900436, %v372_v16  ;;  %v384_v24 = vmul.f32 %v1715_v18, %v372_v16  ;;  %931 = vperm.xlu0 %1811, %v921_v58   ;;  %941 = vperm.xlu1 %1812, %v923_v63   ;;  %s367_s16 = scalar_lea.vmem [#allocation6], %s1712_s21 }
  0x51   : > { %v438_v23 = vmul.f32 0.4570458, %v372_v16  ;;  %v387_v25 = vrot.slane %v386_v19, 4  ;;  %v402_v26 = vmul.f32 0.9461747, %v374_v17  ;;  %v410_v27 = vrot.slane %v374_v17, 5 }
  0x52   : > { %v422_v28 = vmul.f32 -3.0, %v374_v17  ;;  %v440_v29 = vmul.f32 5.0, %v374_v17  ;;  %v454_v30 = vmul.f32 0.37317634, %v372_v16  ;;  %v468_v31 = vmul.f32 1.4453057, %v372_v16 }
  0x53   : > { %v392_v32 = vmul.f32 %v387_v25, %v372_v16  ;;  %v2110_v33 = vmul.f32 1.0925485, %v384_v24  ;;  %v2112_v34 = vmul.f32 -1.0925485, %v384_v24  ;;  %v2114_v35 = vadd.f32 -0.31539157, %v402_v26 }
  0x54   : > { %v411_v36 = vrot.slane %v410_v27, 4  ;;  %v434_v37 = vmul.f32 2.8906114, %v384_v24  ;;  %v442_v38 = vsub.f32 1.0, %v440_v29  ;;  %v1721_v39 = vadd.f32 -3.0, %v440_v29  ;;  %936 = vperm.xlu0 %1811, %v922_v4   ;;  %946 = vperm.xlu1 %1812, %v924_v15   ;;  %v1204_v15 = vld [vmem:[%s2545_s5] sm:$0xff] }
  0x55   : > { %v2119_v41 = vmul.f32 -1.0925485, %v392_v32  ;;  %v478_v42 = vsub.f32 0.0, %v374_v17  ;;  %v480_v43 = vmul.f32 3.0, %v374_v17  ;;  %vm837_vm3 = vcmask 1043456   ;;  %s1768_s23 = sshll.u32 %s2008_s9, 9 }
  0x56   : > { %v416_v44 = vsub.f32 %v374_v17, %v411_v36  ;;  %v424_v45 = vadd.f32 %v422_v28, %v411_v36  ;;  %v1719_v46 = vrot.slane %v442_v38, 9  ;;  %v2121_v47 = vsub.s32 2, %v497_v5  ;;  %s1614_s25 = sshll.u32 %s367_s16, 4  ;;  %s2497_s26 = scalar_lea.hbm %s2548_s8, %s1768_s23  ;;  %s2499_s25 = int_to_ptr.vmem [resolvable:$true] %s1614_s25 }
  0x57   : > { %v1723_v48 = vrot.slane %v442_v38, 10  ;;  %v1725_v49 = vrot.slane %v480_v43, 9  ;;  %vm842_vm4 = vcmask 1044480   ;;  %v2125_v52 = vmul.f32 %v434_v37, %v387_v25  ;;  %v926_v38 = vld [vmem:[%s2543_s3 + $0x28] sm:$0xff]  ;;  %s1600_s12 = scalar_lea.sflag [#allocation5], %s2078_s14  ;;  %s1871_s21 = scalar_lea.vmem %s2499_s25, 512 }
  0x58   : > { %v2123_v50 = vmul.f32 0.54627424, %v416_v44  ;;  %v428_v51 = vrot.slane %v424_v45, 7  ;;  %v472_v53 = vrot.slane %v416_v44, 6  ;;  %vm847_vm5 = vcmask 1045504   ;;  %956 = vperm.xlu1 %1812, %v926_v38   ;;  %p1872_p6 = scmp.ne.s32.totalorder %s2499_s25, %s1871_s21  ;;  %p2559_p9 = scmp.ne.s32.totalorder %s2555_s17, 0 }
  0x59   : > { %v2127_v54 = vmul.f32 %v1719_v46, %v438_v23  ;;  %v2129_v55 = vmul.f32 %v1721_v39, %v454_v30  ;;  %v490_v56 = vadd.f32 %v1725_v49, %v478_v42  ;;  %vm852_vm6 = vcmask 1046528   ;;  %v925_v30 = vld [vmem:[%s2543_s3 + $0x20] sm:$0xff]  ;;  %s1941_s9 = smov [#allocation6]  }
  0x5a   : > { %v2133_v57 = vmul.f32 %v2117_v40, %v2117_v40  ;;  %v2138_v59 = vmul.f32 %v428_v51, %v420_v22  ;;  %v2140_v60 = vmul.f32 %v1723_v48, %v438_v23  ;;  %v503_v61 = vrot.slane %v2106_v20, %v2097_v9  ;;  %951 = vperm.xlu0 %1811, %v925_v30   ;;  %v927_v51 = vld [vmem:[%s2543_s3 + $0x30] sm:$0xff]  ;;  %v1205_v30 = vld [vmem:[%s2545_s5 + $0x8] sm:$0xff]  ;;  %p1873_p10 = pnand %p1872_p6, %p2559_p9  ;;  %s1875_s19 = sshll.u32 %s1941_s9, 4  ;;  %s1876_s19 = int_to_ptr.vmem [resolvable:$false] %s1875_s19 }
  0x5b   : > { %v525_v62 = vrot.slane %v2108_v21, %v2099_v10  ;;  %v2149_v0 = vmul.f32 %v472_v53, %v468_v31  ;;  %v545_v1 = vrot.slane %v2106_v20, %v2103_v13  ;;  %v567_v2 = vrot.slane %v2110_v33, %v2103_v13  ;;  %s1877_s0 = scalar_lea.vmem %s1876_s19, 1024  ;;  %p1878_p7 = scmp.lt.s32.totalorder %s2499_s25, %s1876_s19 }
  0x5c   : > { %v655_v3 = vrot.slane %v2123_v50, %v2103_v13  ;;  %v2160_v5 = vmul.f32 %v490_v56, %v420_v22  ;;  %v589_v8 = vrot.slane %v2112_v34, %v2097_v9  ;;  %v677_v11 = vrot.slane %v2138_v59, %v2097_v9  ;;  %p1874_p4 = pneg %p1873_p10  ;;  %p1879_p8 = scmp.lt.s32.totalorder %s1877_s0, %s1871_s21 }
  0x5d   : > { %v699_v14 = vrot.slane %v2125_v52, %v2103_v13  ;;  %v611_v16 = vrot.slane %v2114_v35, %v2099_v10  ;;  %v633_v17 = vrot.slane %v2119_v41, %v2103_v13  ;;  %v721_v18 = vrot.slane %v2127_v54, %v2097_v9 }
  0x5e   : > { %v743_v19 = vrot.slane %v2129_v55, %v2099_v10  ;;  %v765_v22 = vrot.slane %v2140_v60, %v2103_v13  ;;  %v824_v23 = vsel %vm822_vm0, 0.0, %v503_v61  ;;  %v858_v24 = vsel %vm822_vm0, %v655_v3, %v677_v11  ;;  %v928_v3 = vld [vmem:[%s2543_s3 + $0x38] sm:$0xff]  ;;  %961 = vperm.xlu0 %1811, %v927_v51   ;;  %p1880_p11 = por %p1879_p8, %p1878_p7 }
  0x5f   : > { %v1716_v25 = vrot.slane %v2117_v40, 9  ;;  %v787_v26 = vrot.slane %v2149_v0, %v2099_v10  ;;  %v829_v27 = vsel %vm827_vm1, %v824_v23, %v525_v62  ;;  %v862_v28 = vsel %vm827_vm1, %v858_v24, %v699_v14  ;;  %966 = vperm.xlu1 %1812, %v928_v3  }
  0x60   : > { %v388_v29 = vrot.slane %v2117_v40, 6  ;;  %v651_v31 = vrot.slane %v2123_v50, %v2101_v12  ;;  %v809_v32 = vrot.slane %v2160_v5, %v2103_v13  ;;  %v834_v36 = vsel %vm832_vm2, %v829_v27, %v545_v1  ;;  %p1881_p12 = pnand %p1880_p11, %p1874_p4 }
  0x61   : > { %v866_v37 = vsel %vm832_vm2, %v862_v28, %v721_v18  ;;  %v839_v39 = vsel %vm837_vm3, %v834_v36, %v567_v2  ;;  %v385_v43 = vmul.f32 %v1716_v25, %v2117_v40  ;;  %v2205_v44 = vmul.f32 -0.48860252, %v2117_v40 }
  0x62   : > { %v870_v42 = vsel %vm837_vm3, %v866_v37, %v743_v19  ;;  %v844_v45 = vsel %vm842_vm4, %v839_v39, %v589_v8  ;;  %v389_v48 = vrot.slane %v388_v29, 4  ;;  %v2210_v49 = vmul.f32 0.48860252, %v2117_v40  ;;  %1214 = vperm.xlu0 %1811, %v1204_v15  }
  0x63   : > { %v874_v46 = vsel %vm842_vm4, %v870_v42, %v765_v22  ;;  %v673_v53 = vrot.slane %v2138_v59, %v2095_v7  ;;  %v849_v56 = vsel %vm847_vm5, %v844_v45, %v611_v16  ;;  %v403_v61 = vmul.f32 0.9461747, %v2133_v57  ;;  %1219 = vperm.xlu1 %1812, %v1205_v30   ;;  %v1480_v59 = vld [vmem:[%s2547_s7] sm:$0xff] }
  0x64   : > { %v878_v58 = vsel %vm847_vm5, %v874_v46, %v787_v26  ;;  %v854_v62 = vsel %vm852_vm6, %v849_v56, %v633_v17  ;;  %v2222_v1 = vmul.f32 1.0925485, %v385_v43  ;;  %v412_v2 = vrot.slane %v2133_v57, 5 }
  0x65   : > { %v882_v63 = vsel %vm852_vm6, %v878_v58, %v809_v32  ;;  %v393_v8 = vmul.f32 %v389_v48, %v2117_v40  ;;  %v2229_v11 = vmul.f32 -1.0925485, %v385_v43  ;;  %v423_v14 = vmul.f32 -3.0, %v2133_v57  ;;  %v1206_v58 = vld [vmem:[%s2545_s5 + $0x10] sm:$0xff] }
  0x66   : > { %v886_v4 = vpack.c.bf16 %v882_v63, %v854_v62  ;;  %v413_v16 = vrot.slane %v412_v2, 4  ;;  %v421_v17 = vmul.f32 0.5900436, %v2117_v40  ;;  %v435_v18 = vmul.f32 2.8906114, %v385_v43  ;;  %1224 = vperm.xlu0 %1811, %v1206_v58  }
  0x67   : > { %v441_v19 = vmul.f32 5.0, %v2133_v57  ;;  %v439_v22 = vmul.f32 0.4570458, %v2117_v40  ;;  %v455_v23 = vmul.f32 0.37317634, %v2117_v40  ;;  %v479_v24 = vsub.f32 0.0, %v2133_v57 }
  0x68   : > { %1004 = vmatprep.subr.bf16.mxu0 %v886_v4  ;;  %v481_v25 = vmul.f32 3.0, %v2133_v57  ;;  %v417_v26 = vsub.f32 %v2133_v57, %v413_v16  ;;  %v425_v27 = vadd.f32 %v423_v14, %v413_v16  ;;  %v695_v32 = vrot.slane %v2125_v52, %v2101_v12 }
  0x69   : > { %v443_v28 = vsub.f32 1.0, %v441_v19  ;;  %v1722_v29 = vadd.f32 -3.0, %v441_v19  ;;  %v2247_v36 = vadd.f32 -0.31539157, %v403_v61  ;;  %v2249_v37 = vmul.f32 -1.0925485, %v393_v8 }
  0x6a   : > { %v1726_v38 = vrot.slane %v481_v25, 9  ;;  %v2251_v39 = vmul.f32 0.54627424, %v417_v26  ;;  %v429_v42 = vrot.slane %v425_v27, 7  ;;  %v469_v57 = vmul.f32 1.4453057, %v2117_v40 }
  0x6b   : > { %v1720_v43 = vrot.slane %v443_v28, 9  ;;  %v2254_v45 = vmul.f32 %v435_v18, %v389_v48  ;;  %v1724_v46 = vrot.slane %v443_v28, 10  ;;  %v473_v51 = vrot.slane %v417_v26, 6  ;;  %v1207_v48 = vld [vmem:[%s2545_s5 + $0x18] sm:$0xff] }
  0x6c   : > { %v491_v56 = vadd.f32 %v1726_v38, %v479_v24  ;;  %v2259_v61 = vmul.f32 %v429_v42, %v421_v17  ;;  %v2263_v63 = vmul.f32 %v1722_v29, %v455_v23  ;;  %v511_v40 = vrot.slane %v2205_v44, %v2097_v9  ;;  %v1208_v24 = vld [vmem:[%s2545_s5 + $0x20] sm:$0xff]  ;;  %1229 = vperm.xlu1 %1812, %v1207_v48  }
  0x6d   : > { %v2261_v62 = vmul.f32 %v1720_v43, %v439_v22  ;;  %v2270_v2 = vmul.f32 %v1724_v46, %v439_v22  ;;  %v533_v3 = vrot.slane %v2210_v49, %v2099_v10  ;;  %v553_v4 = vrot.slane %v2205_v44, %v2103_v13  ;;  %1234 = vperm.xlu0 %1811, %v1208_v24  }
  0x6e   : > { %v575_v8 = vrot.slane %v2222_v1, %v2103_v13  ;;  %v2278_v14 = vmul.f32 %v473_v51, %v469_v57  ;;  %v2280_v15 = vmul.f32 %v491_v56, %v421_v17  ;;  %v663_v16 = vrot.slane %v2251_v39, %v2103_v13 }
  0x6f   : > { %v685_v18 = vrot.slane %v2259_v61, %v2097_v9  ;;  %v597_v19 = vrot.slane %v2229_v11, %v2097_v9  ;;  %v619_v22 = vrot.slane %v2247_v36, %v2099_v10  ;;  %v707_v23 = vrot.slane %v2254_v45, %v2103_v13 }
  0x70   : > { %v729_v17 = vrot.slane %v2261_v62, %v2097_v9  ;;  %v641_v25 = vrot.slane %v2249_v37, %v2103_v13  ;;  %v659_v26 = vrot.slane %v2251_v39, %v2101_v12  ;;  %v751_v27 = vrot.slane %v2263_v63, %v2099_v10  ;;  %v1209_v9 = vld [vmem:[%s2545_s5 + $0x28] sm:$0xff] }
  0x71   : > { %v826_v28 = vsel %vm822_vm0, 0.0, %v511_v40  ;;  %v681_v29 = vrot.slane %v2259_v61, %v2095_v7  ;;  %v773_v30 = vrot.slane %v2270_v2, %v2103_v13  ;;  %v860_v42 = vsel %vm822_vm0, %v663_v16, %v685_v18  ;;  %1239 = vperm.xlu1 %1812, %v1209_v9   ;;  %v1211_v16 = vld [vmem:[%s2545_s5 + $0x38] sm:$0xff] }
  0x72   : > { %v831_v38 = vsel %vm827_vm1, %v826_v28, %v533_v3  ;;  %v795_v43 = vrot.slane %v2278_v14, %v2099_v10  ;;  %v817_v57 = vrot.slane %v2280_v15, %v2103_v13  ;;  %v864_v51 = vsel %vm827_vm1, %v860_v42, %v707_v23  ;;  %v1210_v10 = vld [vmem:[%s2545_s5 + $0x30] sm:$0xff] }
  0x73   : > { %v836_v46 = vsel %vm832_vm2, %v831_v38, %v553_v4  ;;  %v868_v58 = vsel %vm832_vm2, %v864_v51, %v729_v17  ;;  %v499_v40 = vrot.slane %v2106_v20, %v2095_v7  ;;  %v521_v48 = vrot.slane %v2108_v21, %v2121_v47  ;;  %1244 = vperm.xlu0 %1811, %v1210_v10  }
  0x74   : > { %v841_v56 = vsel %vm837_vm3, %v836_v46, %v575_v8  ;;  %v872_v3 = vsel %vm837_vm3, %v868_v58, %v751_v27  ;;  %v541_v4 = vrot.slane %v2106_v20, %v2101_v12  ;;  %v563_v8 = vrot.slane %v2110_v33, %v2101_v12 }
  0x75   : > { %v846_v13 = vsel %vm842_vm4, %v841_v56, %v597_v19  ;;  %v876_v18 = vsel %vm842_vm4, %v872_v3, %v773_v30  ;;  %v585_v23 = vrot.slane %v2112_v34, %v2095_v7  ;;  %v717_v19 = vrot.slane %v2127_v54, %v2095_v7  ;;  %1249 = vperm.xlu1 %1812, %v1211_v16   ;;  %v1820_v3 = vld [vmem:[%s2542_s2 + $0x8] sm:$0xff]  }
  0x76   : > { %v851_v21 = vsel %vm847_vm5, %v846_v13, %v619_v22  ;;  %v880_v20 = vsel %vm847_vm5, %v876_v18, %v795_v43  ;;  %v607_v33 = vrot.slane %v2114_v35, %v2121_v47  ;;  %v739_v24 = vrot.slane %v2129_v55, %v2121_v47 }
  0x77   : > { %v856_v17 = vsel %vm852_vm6, %v851_v21, %v641_v25  ;;  %v884_v22 = vsel %vm852_vm6, %v880_v20, %v817_v57  ;;  %v761_v27 = vrot.slane %v2140_v60, %v2101_v12  ;;  %v823_v34 = vsel %vm822_vm0, 0.0, %v499_v40  ;;  %1483 = vperm.xlu0 %1811, %v1480_v59  }
  0x78   : > { %v857_v54 = vsel %vm822_vm0, %v651_v31, %v673_v53  ;;  %v888_v35 = vpack.c.bf16 %v884_v22, %v856_v17  ;;  %v783_v55 = vrot.slane %v2149_v0, %v2121_v47  ;;  %v828_v25 = vsel %vm827_vm1, %v823_v34, %v521_v48  ;;  %v1819_v48 = vld [vmem:[%s2542_s2] sm:$0xff]  }
  0x79   : > { %v861_v60 = vsel %vm827_vm1, %v857_v54, %v695_v32  ;;  %vm989_vm7 = vcmask 261120   ;;  %v629_v50 = vrot.slane %v2119_v41, %v2101_v12  ;;  %v805_v31 = vrot.slane %v2160_v5, %v2101_v12 }
  0x7a   : > { %v833_v0 = vsel %vm832_vm2, %v828_v25, %v541_v4  ;;  %v865_v53 = vsel %vm832_vm2, %v861_v60, %v717_v19  ;;  %v703_v52 = vrot.slane %v2254_v45, %v2101_v12  ;;  %1077 = vmatprep.subr.bf16.mxu1 %v888_v35  ;;  %v507_v9 = vrot.slane %v2205_v44, %v2095_v7  ;;  %v1821_v4 = vld [vmem:[%s2542_s2 + $0x10] sm:$0xff]  }
  0x7b   : > { %v838_v32 = vsel %vm837_vm3, %v833_v0, %v563_v8  ;;  %v869_v28 = vsel %vm837_vm3, %v865_v53, %v739_v24  ;;  %v529_v5 = vrot.slane %v2210_v49, %v2121_v47  ;;  %v549_v38 = vrot.slane %v2205_v44, %v2101_v12  ;;  %v1822_v8 = vld [vmem:[%s2542_s2 + $0x18] sm:$0xff]  }
  0x7c   : > { %v843_v41 = vsel %vm842_vm4, %v838_v32, %v585_v23  ;;  %v873_v30 = vsel %vm842_vm4, %v869_v28, %v761_v27  ;;  %v571_v43 = vrot.slane %v2222_v1, %v2101_v12  ;;  %v725_v57 = vrot.slane %v2261_v62, %v2095_v7 }
  0x7d   : > { %v848_v45 = vsel %vm847_vm5, %v843_v41, %v607_v33  ;;  %v877_v42 = vsel %vm847_vm5, %v873_v30, %v783_v55  ;;  %v593_v49 = vrot.slane %v2229_v11, %v2095_v7  ;;  %v747_v44 = vrot.slane %v2263_v63, %v2121_v47 }
  0x7e   : > { %v853_v46 = vsel %vm852_vm6, %v848_v45, %v629_v50  ;;  %v881_v51 = vsel %vm852_vm6, %v877_v42, %v805_v31  ;;  %v769_v58 = vrot.slane %v2270_v2, %v2101_v12  ;;  %v825_v40 = vsel %vm822_vm0, 0.0, %v507_v9 }
  0x7f   : > { %v885_v56 = vpack.c.bf16 %v881_v51, %v853_v46  ;;  %v859_v1 = vsel %vm822_vm0, %v659_v26, %v681_v29  ;;  %v615_v11 = vrot.slane %v2247_v36, %v2121_v47  ;;  %v791_v62 = vrot.slane %v2278_v14, %v2121_v47 }
  0x80   : > { %v830_v63 = vsel %vm827_vm1, %v825_v40, %v529_v5  ;;  %v863_v2 = vsel %vm827_vm1, %v859_v1, %v703_v52  ;;  %v637_v7 = vrot.slane %v2249_v37, %v2101_v12  ;;  %v813_v39 = vrot.slane %v2280_v15, %v2101_v12 }
  0x81   : > { %1005 = vmatpush1.bf16.msra.mxu0 %v885_v56  ;;  %v835_v36 = vsel %vm832_vm2, %v830_v63, %v549_v38  ;;  %v867_v61 = vsel %vm832_vm2, %v863_v2, %v725_v57  ;;  %vm1272_vm8 = vcmask 523264  }
  0x82   : > { %v840_v47 = vsel %vm837_vm3, %v835_v36, %v571_v43  ;;  %v871_v14 = vsel %vm837_vm3, %v867_v61, %v747_v44 }
  0x83   : > { %v845_v26 = vsel %vm842_vm4, %v840_v47, %v593_v49  ;;  %v875_v29 = vsel %vm842_vm4, %v871_v14, %v769_v58 }
  0x84   : > { %v850_v10 = vsel %vm847_vm5, %v845_v26, %v615_v11  ;;  %v879_v13 = vsel %vm847_vm5, %v875_v29, %v791_v62  ;;  %1735 = vmatmul.mubr.msk.bf16.vlgmr.msra.gmra.mrb[0].mxu0 %vm989_vm7, %v1819_v48 }
  0x85   : > { %v855_v12 = vsel %vm852_vm6, %v850_v10, %v637_v7  ;;  %v883_v37 = vsel %vm852_vm6, %v879_v13, %v813_v39  ;;  %1044 = vmatprep.mubr.bf16.mxu0 %v1940_v6 }
  0x86   : > { %v887_v15 = vpack.c.bf16 %v883_v37, %v855_v12 }
  0x88   : > { %1078 = vmatpush1.bf16.msra.mxu1 %v887_v15 }
  0x8b   : > { %1739 = vmatmul.mubr.msk.bf16.vlgmr.msra.gmra.mrb[0].mxu1 %vm989_vm7, %v1819_v48 }
  0x8c   : > { %1117 = vmatprep.mubr.bf16.mxu1 %v1940_v6  ;;  %1736 = vmatmul.mubr.msk.bf16.gmra.mrb[4].mxu0 %vm989_vm7, %v1820_v3 }
  0x8d   : > { %1054 = vmatprep.mubr.bf16.mxu0 %v1940_v6 }
  0x93   : > { %1740 = vmatmul.mubr.msk.bf16.gmra.mrb[4].mxu1 %vm989_vm7, %v1820_v3 }
  0x94   : > { %1127 = vmatprep.mubr.bf16.mxu1 %v1940_v6  ;;  %1737 = vmatmul.mubr.msk.bf16.gmra.mrb[8].mxu0 %vm989_vm7, %v1821_v4 }
  0x95   : > { %1064 = vmatprep.mubr.bf16.mxu0 %v1940_v6 }
  0x9b   : > { %1741 = vmatmul.mubr.msk.bf16.gmra.mrb[8].mxu1 %vm989_vm7, %v1821_v4 }
  0x9c   : > { %1137 = vmatprep.mubr.bf16.mxu1 %v1940_v6  ;;  %1738 = vmatmul.mubr.msk.bf16.gmra.mrb[12].mxu0 %vm989_vm7, %v1822_v8 }
  0x9d   : > { %1317 = vmatprep.mubr.bf16.mxu0 %v1940_v6 }
  0xa3   : > { %1742 = vmatmul.mubr.msk.bf16.gmra.mrb[12].mxu1 %vm989_vm7, %v1822_v8 }
  0xa4   : > { %1390 = vmatprep.mubr.bf16.mxu1 %v1940_v6 }
  0xcf   : > { %v932_v16 = vpop.permute.xlu0 %931  ;;  %v942_v18 = vpop.permute.xlu1 %941 }
  0xd3   : > { %v937_v17 = vpop.permute.xlu0 %936  ;;  %v947_v25 = vpop.permute.xlu1 %946 }
  0xd7   : > { %v957_v63 = vpop.permute.xlu1 %956 }
  0xd9   : > { %v952_v40 = vpop.permute.xlu0 %951 }
 0x157   : > { %v1036_v21 = vpop.f32.mrb[0].mxu0 }
 0x158   : > { %v1037_v23 = vadd.f32 %v1036_v21, %v932_v16  ;;  %v1038_v19 = vpop.f32.mrb[1].mxu0 }
 0x159   : > { %v1039_v20 = vadd.f32 %v1038_v19, %v932_v16  ;;  %v1040_v33 = vpop.f32.mrb[2].mxu0 }
 0x15a   : > { %v1041_v24 = vadd.f32 %v1040_v33, %v937_v17  ;;  %v1042_v22 = vpop.f32.mrb[3].mxu0  ;;  %v1148_v34 = vmax.f32 %v1037_v23, 0.0  ;;  %v962_v33 = vpop.permute.xlu0 %961 }
 0x15b   : > { %v1043_v27 = vadd.f32 %v1042_v22, %v937_v17  ;;  %v1149_v35 = vmax.f32 %v1039_v20, 0.0 }
 0x15c   : > { %v1152_v54 = vmax.f32 %v1041_v24, 0.0 }
 0x15d   : > { %v1153_v55 = vmax.f32 %v1043_v27, 0.0 }
 0x15e   : > { %v1109_v60 = vpop.f32.mrb[0].mxu1  ;;  %v1180_v59 = vpack.c.bf16 %v1152_v54, %v1148_v34  ;;  %v967_v34 = vpop.permute.xlu1 %966 }
 0x15f   : > { %v1110_v50 = vadd.f32 %v1109_v60, %v932_v16  ;;  %v1111_v31 = vpop.f32.mrb[1].mxu1  ;;  %v1181_v0 = vpack.c.bf16 %v1153_v55, %v1149_v35  ;;  %v1046_v53 = vpop.f32.mrb[4].mxu0 }
 0x160   : > { %v1112_v52 = vadd.f32 %v1111_v31, %v932_v16  ;;  %v1113_v32 = vpop.f32.mrb[2].mxu1  ;;  %v1047_v28 = vadd.f32 %v1046_v53, %v942_v18  ;;  %v1048_v9 = vpop.f32.mrb[5].mxu0 }
 0x161   : > { %v1114_v41 = vadd.f32 %v1113_v32, %v937_v17  ;;  %v1115_v30 = vpop.f32.mrb[3].mxu1  ;;  %v1049_v5 = vadd.f32 %v1048_v9, %v942_v18  ;;  %v1050_v38 = vpop.f32.mrb[6].mxu0  ;;  %1285 = vmatprep.subr.bf16.mxu0 %v1181_v0  ;;  %v1150_v57 = vmax.f32 %v1110_v50, 0.0 }
 0x162   : > { %v1116_v45 = vadd.f32 %v1115_v30, %v937_v17  ;;  %v1051_v42 = vadd.f32 %v1050_v38, %v947_v25  ;;  %v1052_v43 = vpop.f32.mrb[7].mxu0  ;;  %1286 = vmatpush1.bf16.msra.mxu0 %v1180_v59  ;;  %v1151_v49 = vmax.f32 %v1112_v52, 0.0  ;;  %v1156_v56 = vmax.f32 %v1047_v28, 0.0 }
 0x163   : > { %v1154_v46 = vmax.f32 %v1114_v41, 0.0  ;;  %v1053_v51 = vadd.f32 %v1052_v43, %v947_v25  ;;  %v1157_v11 = vmax.f32 %v1049_v5, 0.0 }
 0x164   : > { %v1155_v44 = vmax.f32 %v1116_v45, 0.0  ;;  %v1160_v58 = vmax.f32 %v1051_v42, 0.0 }
 0x165   : > { %v1182_v1 = vpack.c.bf16 %v1154_v46, %v1150_v57  ;;  %v1161_v62 = vmax.f32 %v1053_v51, 0.0 }
 0x166   : > { %v1183_v2 = vpack.c.bf16 %v1155_v44, %v1151_v49  ;;  %v1119_v48 = vpop.f32.mrb[4].mxu1  ;;  %v1184_v7 = vpack.c.bf16 %v1160_v58, %v1156_v56 }
 0x167   : > { %v1120_v39 = vadd.f32 %v1119_v48, %v942_v18  ;;  %v1121_v36 = vpop.f32.mrb[5].mxu1  ;;  %v1185_v61 = vpack.c.bf16 %v1161_v62, %v1157_v11  ;;  %v1056_v47 = vpop.f32.mrb[8].mxu0 }
 0x168   : > { %v1122_v14 = vadd.f32 %v1121_v36, %v942_v18  ;;  %v1123_v26 = vpop.f32.mrb[6].mxu1  ;;  %1358 = vmatprep.subr.bf16.mxu1 %v1183_v2  ;;  %v1057_v29 = vadd.f32 %v1056_v47, %v952_v40  ;;  %v1058_v10 = vpop.f32.mrb[9].mxu0 }
 0x169   : > { %v1124_v13 = vadd.f32 %v1123_v26, %v947_v25  ;;  %v1125_v12 = vpop.f32.mrb[7].mxu1  ;;  %1359 = vmatpush1.bf16.msra.mxu1 %v1182_v1  ;;  %v1059_v37 = vadd.f32 %v1058_v10, %v952_v40  ;;  %v1060_v15 = vpop.f32.mrb[10].mxu0  ;;  %1287 = vmatprep.subr.bf16.mxu0 %v1185_v61  ;;  %v1158_v16 = vmax.f32 %v1120_v39, 0.0  ;;  %v1823_v61 = vld [vmem:[%s2544_s4] sm:$0xff]  }
 0x16a   : > { %v1126_v3 = vadd.f32 %v1125_v12, %v947_v25  ;;  %v1061_v4 = vadd.f32 %v1060_v15, %v957_v63  ;;  %v1062_v8 = vpop.f32.mrb[11].mxu0  ;;  %1288 = vmatpush1.bf16.msra.mxu0 %v1184_v7  ;;  %v1159_v19 = vmax.f32 %v1122_v14, 0.0  ;;  %v1164_v18 = vmax.f32 %v1057_v29, 0.0  ;;  %v1825_v15 = vld [vmem:[%s2544_s4 + $0x10] sm:$0xff]  }
 0x16b   : > { %v1162_v21 = vmax.f32 %v1124_v13, 0.0  ;;  %v1063_v23 = vadd.f32 %v1062_v8, %v957_v63  ;;  %v1165_v22 = vmax.f32 %v1059_v37, 0.0  ;;  %v1824_v37 = vld [vmem:[%s2544_s4 + $0x8] sm:$0xff]  }
 0x16c   : > { %v1163_v17 = vmax.f32 %v1126_v3, 0.0  ;;  %v1168_v20 = vmax.f32 %v1061_v4, 0.0  ;;  %v1826_v3 = vld [vmem:[%s2544_s4 + $0x18] sm:$0xff]   ;;  %v1215_v4 = vpop.permute.xlu0 %1214 }
 0x16d   : > { %v1186_v24 = vpack.c.bf16 %v1162_v21, %v1158_v16  ;;  %v1169_v27 = vmax.f32 %v1063_v23, 0.0  ;;  %v1220_v16 = vpop.permute.xlu1 %1219 }
 0x16e   : > { %v1187_v54 = vpack.c.bf16 %v1163_v17, %v1159_v19  ;;  %v1129_v35 = vpop.f32.mrb[8].mxu1  ;;  %v1188_v55 = vpack.c.bf16 %v1168_v20, %v1164_v18 }
 0x16f   : > { %v1130_v60 = vadd.f32 %v1129_v35, %v952_v40  ;;  %v1131_v25 = vpop.f32.mrb[9].mxu1  ;;  %v1189_v59 = vpack.c.bf16 %v1169_v27, %v1165_v22  ;;  %v1066_v50 = vpop.f32.mrb[12].mxu0 }
 0x170   : > { %v1132_v31 = vadd.f32 %v1131_v25, %v952_v40  ;;  %v1133_v0 = vpop.f32.mrb[10].mxu1  ;;  %1360 = vmatprep.subr.bf16.mxu1 %v1187_v54  ;;  %v1067_v53 = vadd.f32 %v1066_v50, %v962_v33  ;;  %v1068_v52 = vpop.f32.mrb[13].mxu0 }
 0x171   : > { %v1134_v32 = vadd.f32 %v1133_v0, %v957_v63  ;;  %v1135_v28 = vpop.f32.mrb[11].mxu1  ;;  %1361 = vmatpush1.bf16.msra.mxu1 %v1186_v24  ;;  %v1069_v9 = vadd.f32 %v1068_v52, %v962_v33  ;;  %v1070_v41 = vpop.f32.mrb[14].mxu0  ;;  %1289 = vmatprep.subr.bf16.mxu0 %v1189_v59  ;;  %v1166_v45 = vmax.f32 %v1130_v60, 0.0 }
 0x172   : > { %v1136_v30 = vadd.f32 %v1135_v28, %v957_v63  ;;  %v1071_v5 = vadd.f32 %v1070_v41, %v967_v34  ;;  %v1072_v38 = vpop.f32.mrb[15].mxu0  ;;  %1290 = vmatpush1.bf16.msra.mxu0 %v1188_v55  ;;  %v1167_v57 = vmax.f32 %v1132_v31, 0.0  ;;  %v1172_v51 = vmax.f32 %v1067_v53, 0.0  ;;  %v1225_v27 = vpop.permute.xlu0 %1224 }
 0x173   : > { %v1170_v42 = vmax.f32 %v1134_v32, 0.0  ;;  %v1073_v43 = vadd.f32 %v1072_v38, %v967_v34  ;;  %v1173_v56 = vmax.f32 %v1069_v9, 0.0  ;;  %v1230_v35 = vpop.permute.xlu1 %1229 }
 0x174   : > { %v1171_v46 = vmax.f32 %v1136_v30, 0.0  ;;  %v1176_v49 = vmax.f32 %v1071_v5, 0.0 }
 0x175   : > { %v1190_v44 = vpack.c.bf16 %v1170_v42, %v1166_v45  ;;  %v1177_v58 = vmax.f32 %v1073_v43, 0.0 }
 0x176   : > { %v1191_v40 = vpack.c.bf16 %v1171_v46, %v1167_v57  ;;  %v1139_v1 = vpop.f32.mrb[12].mxu1  ;;  %v1192_v11 = vpack.c.bf16 %v1176_v49, %v1172_v51 }
 0x177   : > { %v1140_v62 = vadd.f32 %v1139_v1, %v962_v33  ;;  %v1141_v2 = vpop.f32.mrb[13].mxu1  ;;  %v1193_v48 = vpack.c.bf16 %v1177_v58, %v1173_v56  ;;  %v1240_v1 = vpop.permute.xlu1 %1239 }
 0x178   : > { %v1142_v63 = vadd.f32 %v1141_v2, %v962_v33  ;;  %v1143_v7 = vpop.f32.mrb[14].mxu1  ;;  %1362 = vmatprep.subr.bf16.mxu1 %v1191_v40 }
 0x179   : > { %v1144_v39 = vadd.f32 %v1143_v7, %v967_v34  ;;  %v1145_v36 = vpop.f32.mrb[15].mxu1  ;;  %1363 = vmatpush1.bf16.msra.mxu1 %v1190_v44  ;;  %1291 = vmatprep.subr.bf16.mxu0 %v1193_v48  ;;  %v1174_v14 = vmax.f32 %v1140_v62, 0.0  ;;  %v1235_v44 = vpop.permute.xlu0 %1234 }
 0x17a   : > { %v1146_v47 = vadd.f32 %v1145_v36, %v967_v34  ;;  %1292 = vmatpush1.bf16.msra.mxu0 %v1192_v11  ;;  %v1175_v29 = vmax.f32 %v1142_v63, 0.0 }
 0x17b   : > { %v1178_v26 = vmax.f32 %v1144_v39, 0.0 }
 0x17c   : > { %v1179_v10 = vmax.f32 %v1146_v47, 0.0 }
 0x17d   : > { %v1194_v13 = vpack.c.bf16 %v1178_v26, %v1174_v14  ;;  %1747 = vmatmul.mubr.msk.bf16.vlgmr.msra.gmra.mrb[16].mxu0 %vm1272_vm8, %v1823_v61 }
 0x17e   : > { %v1195_v12 = vpack.c.bf16 %v1179_v10, %v1175_v29  ;;  %1327 = vmatprep.mubr.bf16.mxu0 %v1940_v6 }
 0x180   : > { %1364 = vmatprep.subr.bf16.mxu1 %v1195_v12 }
 0x181   : > { %1365 = vmatpush1.bf16.msra.mxu1 %v1194_v13 }
 0x184   : > { %1751 = vmatmul.mubr.msk.bf16.vlgmr.msra.gmra.mrb[16].mxu1 %vm1272_vm8, %v1823_v61 }
 0x185   : > { %1400 = vmatprep.mubr.bf16.mxu1 %v1940_v6  ;;  %1748 = vmatmul.mubr.msk.bf16.gmra.mrb[20].mxu0 %vm1272_vm8, %v1824_v37 }
 0x186   : > { %1337 = vmatprep.mubr.bf16.mxu0 %v1940_v6 }
 0x18c   : > { %1752 = vmatmul.mubr.msk.bf16.gmra.mrb[20].mxu1 %vm1272_vm8, %v1824_v37 }
 0x18d   : > { %1410 = vmatprep.mubr.bf16.mxu1 %v1940_v6  ;;  %1749 = vmatmul.mubr.msk.bf16.gmra.mrb[24].mxu0 %vm1272_vm8, %v1825_v15 }
 0x18e   : > { %1347 = vmatprep.mubr.bf16.mxu0 %v1940_v6 }
 0x194   : > { %1753 = vmatmul.mubr.msk.bf16.gmra.mrb[24].mxu1 %vm1272_vm8, %v1825_v15 }
 0x195   : > { %1420 = vmatprep.mubr.bf16.mxu1 %v1940_v6  ;;  %1750 = vmatmul.mubr.msk.bf16.gmra.mrb[28].mxu0 %vm1272_vm8, %v1826_v3 }
 0x196   : > { %1521 = vmatprep.mubr.bf16.mxu0 %v1940_v6 }
 0x19c   : > { %1754 = vmatmul.mubr.msk.bf16.gmra.mrb[28].mxu1 %vm1272_vm8, %v1826_v3 }
 0x19d   : > { %1562 = vmatprep.mubr.bf16.mxu1 %v1940_v6 }
 0x250   : > { %v1319_v8 = vpop.f32.mrb[16].mxu0 }
 0x251   : > { %v1320_v21 = vadd.f32 %v1319_v8, %v1215_v4  ;;  %v1321_v23 = vpop.f32.mrb[17].mxu0 }
 0x252   : > { %v1322_v19 = vadd.f32 %v1321_v23, %v1215_v4  ;;  %v1323_v17 = vpop.f32.mrb[18].mxu0 }
 0x253   : > { %v1324_v18 = vadd.f32 %v1323_v17, %v1220_v16  ;;  %v1325_v20 = vpop.f32.mrb[19].mxu0  ;;  %v1431_v24 = vmax.f32 %v1320_v21, 0.0  ;;  %v1245_v17 = vpop.permute.xlu0 %1244 }
 0x254   : > { %v1326_v33 = vadd.f32 %v1325_v20, %v1220_v16  ;;  %v1432_v34 = vmax.f32 %v1322_v19, 0.0 }
 0x255   : > { %v1435_v22 = vmax.f32 %v1324_v18, 0.0 }
 0x256   : > { %v1436_v54 = vmax.f32 %v1326_v33, 0.0 }
 0x257   : > { %v1392_v55 = vpop.f32.mrb[16].mxu1  ;;  %v1463_v60 = vpack.c.bf16 %v1435_v22, %v1431_v24  ;;  %v1250_v24 = vpop.permute.xlu1 %1249 }
 0x258   : > { %v1393_v25 = vadd.f32 %v1392_v55, %v1215_v4  ;;  %v1394_v6 = vpop.f32.mrb[17].mxu1  ;;  %v1464_v59 = vpack.c.bf16 %v1436_v54, %v1432_v34  ;;  %v1329_v50 = vpop.f32.mrb[20].mxu0 }
 0x259   : > { %v1395_v31 = vadd.f32 %v1394_v6, %v1215_v4  ;;  %v1396_v0 = vpop.f32.mrb[18].mxu1  ;;  %v1330_v53 = vadd.f32 %v1329_v50, %v1225_v27  ;;  %v1331_v52 = vpop.f32.mrb[21].mxu0 }
 0x25a   : > { %v1397_v32 = vadd.f32 %v1396_v0, %v1220_v16  ;;  %v1398_v28 = vpop.f32.mrb[19].mxu1  ;;  %v1332_v9 = vadd.f32 %v1331_v52, %v1225_v27  ;;  %v1333_v41 = vpop.f32.mrb[22].mxu0  ;;  %1489 = vmatprep.subr.bf16.mxu0 %v1464_v59  ;;  %v1433_v45 = vmax.f32 %v1393_v25, 0.0 }
 0x25b   : > { %v1399_v30 = vadd.f32 %v1398_v28, %v1220_v16  ;;  %v1334_v5 = vadd.f32 %v1333_v41, %v1230_v35  ;;  %v1335_v38 = vpop.f32.mrb[23].mxu0  ;;  %1490 = vmatpush1.bf16.msra.mxu0 %v1463_v60  ;;  %v1434_v57 = vmax.f32 %v1395_v31, 0.0  ;;  %v1439_v51 = vmax.f32 %v1330_v53, 0.0 }
 0x25c   : > { %v1437_v42 = vmax.f32 %v1397_v32, 0.0  ;;  %v1336_v43 = vadd.f32 %v1335_v38, %v1230_v35  ;;  %v1440_v58 = vmax.f32 %v1332_v9, 0.0 }
 0x25d   : > { %v1438_v46 = vmax.f32 %v1399_v30, 0.0  ;;  %v1443_v49 = vmax.f32 %v1334_v5, 0.0 }
 0x25e   : > { %v1465_v56 = vpack.c.bf16 %v1437_v42, %v1433_v45  ;;  %v1444_v40 = vmax.f32 %v1336_v43, 0.0 }
 0x25f   : > { %v1466_v11 = vpack.c.bf16 %v1438_v46, %v1434_v57  ;;  %v1402_v62 = vpop.f32.mrb[20].mxu1  ;;  %v1467_v2 = vpack.c.bf16 %v1443_v49, %v1439_v51 }
 0x260   : > { %v1403_v48 = vadd.f32 %v1402_v62, %v1225_v27  ;;  %v1404_v63 = vpop.f32.mrb[21].mxu1  ;;  %v1468_v7 = vpack.c.bf16 %v1444_v40, %v1440_v58  ;;  %v1339_v39 = vpop.f32.mrb[24].mxu0 }
 0x261   : > { %v1405_v36 = vadd.f32 %v1404_v63, %v1225_v27  ;;  %v1406_v61 = vpop.f32.mrb[22].mxu1  ;;  %1530 = vmatprep.subr.bf16.mxu1 %v1466_v11  ;;  %v1340_v47 = vadd.f32 %v1339_v39, %v1235_v44  ;;  %v1341_v14 = vpop.f32.mrb[25].mxu0 }
 0x262   : > { %v1407_v26 = vadd.f32 %v1406_v61, %v1230_v35  ;;  %v1408_v29 = vpop.f32.mrb[23].mxu1  ;;  %1531 = vmatpush1.bf16.msra.mxu1 %v1465_v56  ;;  %v1342_v10 = vadd.f32 %v1341_v14, %v1235_v44  ;;  %v1343_v13 = vpop.f32.mrb[26].mxu0  ;;  %1491 = vmatprep.subr.bf16.mxu0 %v1468_v7  ;;  %v1441_v3 = vmax.f32 %v1403_v48, 0.0  ;;  %v1479_v7 = vld [vmem:[%s2546_s6] sm:$0xf] }
 0x263   : > { %v1409_v12 = vadd.f32 %v1408_v29, %v1230_v35  ;;  %v1344_v37 = vadd.f32 %v1343_v13, %v1240_v1  ;;  %v1345_v15 = vpop.f32.mrb[27].mxu0  ;;  %1492 = vmatpush1.bf16.msra.mxu0 %v1467_v2  ;;  %v1442_v16 = vmax.f32 %v1405_v36, 0.0  ;;  %v1447_v23 = vmax.f32 %v1340_v47, 0.0  ;;  %v1484_v29 = vpop.permute.xlu0 %1483 }
 0x264   : > { %v1445_v4 = vmax.f32 %v1407_v26, 0.0  ;;  %v1346_v8 = vadd.f32 %v1345_v15, %v1240_v1  ;;  %v1448_v20 = vmax.f32 %v1342_v10, 0.0 }
 0x265   : > { %v1446_v21 = vmax.f32 %v1409_v12, 0.0  ;;  %v1451_v19 = vmax.f32 %v1344_v37, 0.0 }
 0x266   : > { %v1469_v18 = vpack.c.bf16 %v1445_v4, %v1441_v3  ;;  %v1452_v33 = vmax.f32 %v1346_v8, 0.0 }
 0x267   : > { %v1470_v22 = vpack.c.bf16 %v1446_v21, %v1442_v16  ;;  %v1412_v27 = vpop.f32.mrb[24].mxu1  ;;  %v1471_v34 = vpack.c.bf16 %v1451_v19, %v1447_v23 }
 0x268   : > { %v1413_v54 = vadd.f32 %v1412_v27, %v1235_v44  ;;  %v1414_v35 = vpop.f32.mrb[25].mxu1  ;;  %v1472_v55 = vpack.c.bf16 %v1452_v33, %v1448_v20  ;;  %v1349_v60 = vpop.f32.mrb[28].mxu0 }
 0x269   : > { %v1415_v25 = vadd.f32 %v1414_v35, %v1235_v44  ;;  %v1416_v6 = vpop.f32.mrb[26].mxu1  ;;  %1532 = vmatprep.subr.bf16.mxu1 %v1470_v22  ;;  %v1350_v59 = vadd.f32 %v1349_v60, %v1245_v17  ;;  %v1351_v50 = vpop.f32.mrb[29].mxu0 }
 0x26a   : > { %v1417_v31 = vadd.f32 %v1416_v6, %v1240_v1  ;;  %v1418_v0 = vpop.f32.mrb[27].mxu1  ;;  %1533 = vmatpush1.bf16.msra.mxu1 %v1469_v18  ;;  %v1352_v53 = vadd.f32 %v1351_v50, %v1245_v17  ;;  %v1353_v52 = vpop.f32.mrb[30].mxu0  ;;  %1493 = vmatprep.subr.bf16.mxu0 %v1472_v55  ;;  %v1449_v41 = vmax.f32 %v1413_v54, 0.0 }
 0x26b   : > { %v1419_v32 = vadd.f32 %v1418_v0, %v1240_v1  ;;  %v1354_v28 = vadd.f32 %v1353_v52, %v1250_v24  ;;  %v1355_v9 = vpop.f32.mrb[31].mxu0  ;;  %1494 = vmatpush1.bf16.msra.mxu0 %v1471_v34  ;;  %v1450_v38 = vmax.f32 %v1415_v25, 0.0  ;;  %v1455_v42 = vmax.f32 %v1350_v59, 0.0 }
 0x26c   : > { %v1453_v30 = vmax.f32 %v1417_v31, 0.0  ;;  %v1356_v5 = vadd.f32 %v1355_v9, %v1250_v24  ;;  %v1456_v46 = vmax.f32 %v1352_v53, 0.0 }
 0x26d   : > { %v1454_v45 = vmax.f32 %v1419_v32, 0.0  ;;  %v1459_v43 = vmax.f32 %v1354_v28, 0.0 }
 0x26e   : > { %v1473_v57 = vpack.c.bf16 %v1453_v30, %v1449_v41  ;;  %v1460_v51 = vmax.f32 %v1356_v5, 0.0 }
 0x26f   : > { %v1474_v49 = vpack.c.bf16 %v1454_v45, %v1450_v38  ;;  %v1422_v44 = vpop.f32.mrb[28].mxu1  ;;  %v1475_v56 = vpack.c.bf16 %v1459_v43, %v1455_v42 }
 0x270   : > { %v1423_v58 = vadd.f32 %v1422_v44, %v1245_v17  ;;  %v1424_v40 = vpop.f32.mrb[29].mxu1  ;;  %v1476_v11 = vpack.c.bf16 %v1460_v51, %v1456_v46 }
 0x271   : > { %v1425_v1 = vadd.f32 %v1424_v40, %v1245_v17  ;;  %v1426_v62 = vpop.f32.mrb[30].mxu1  ;;  %1534 = vmatprep.subr.bf16.mxu1 %v1474_v49 }
 0x272   : > { %v1427_v2 = vadd.f32 %v1426_v62, %v1250_v24  ;;  %v1428_v48 = vpop.f32.mrb[31].mxu1  ;;  %1535 = vmatpush1.bf16.msra.mxu1 %v1473_v57  ;;  %1495 = vmatprep.subr.bf16.mxu0 %v1476_v11  ;;  %v1457_v39 = vmax.f32 %v1423_v58, 0.0 }
 0x273   : > { %v1429_v63 = vadd.f32 %v1428_v48, %v1250_v24  ;;  %1496 = vmatpush1.bf16.msra.mxu0 %v1475_v56  ;;  %v1458_v61 = vmax.f32 %v1425_v1, 0.0 }
 0x274   : > { %v1461_v36 = vmax.f32 %v1427_v2, 0.0 }
 0x275   : > { %v1462_v47 = vmax.f32 %v1429_v63, 0.0 }
 0x276   : > { %v1477_v14 = vpack.c.bf16 %v1461_v36, %v1457_v39  ;;  %1755 = vmatmul.mubr.msk.bf16.vlgmr.msra.gmra.mrb[32].mxu0 %vm1272_vm8, %v1479_v7 }
 0x277   : > { %v1478_v26 = vpack.c.bf16 %v1462_v47, %v1458_v61 }
 0x279   : > { %1536 = vmatprep.subr.bf16.mxu1 %v1478_v26 }
 0x27a   : > { %1537 = vmatpush1.bf16.msra.mxu1 %v1477_v14 }
 0x27d   : > { %1756 = vmatmul.mubr.msk.bf16.vlgmr.msra.gmra.mrb[32].mxu1 %vm1272_vm8, %v1479_v7 }
 0x349   : > { %v1523_v10 = vpop.f32.mrb[32].mxu0 }
 0x34a   : > { %v1524_v13 = vadd.f32 %v1523_v10, %v1484_v29  ;;  %v1525_v12 = vpop.f32.mrb[33].mxu0 }
 0x34b   : > { %v1526_v37 = vadd.f32 %v1525_v12, %v1484_v29  ;;  %v1527_v15 = vpop.f32.mrb[34].mxu0 }
 0x34c   : > { %v1757_v3 = vmul.f32 -1.442695, %v1524_v13  ;;  %v1528_v4 = vpop.f32.mrb[35].mxu0 }
 0x34d   : > { %v1758_v8 = vmul.f32 -1.442695, %v1526_v37 }
 0x34e   : > { %1827 = vpow2.f32 %v1757_v3 }
 0x34f   : > { %1829 = vpow2.f32 %v1758_v8 }
 0x350   : > { %v1564_v16 = vpop.f32.mrb[32].mxu1 }
 0x351   : > { %v1565_v21 = vadd.f32 %v1564_v16, %v1484_v29  ;;  %v1566_v23 = vpop.f32.mrb[33].mxu1 }
 0x352   : > { %v1567_v19 = vadd.f32 %v1566_v23, %v1484_v29  ;;  %v1568_v17 = vpop.f32.mrb[34].mxu1 }
 0x353   : > { %v1759_v18 = vmul.f32 -1.442695, %v1565_v21  ;;  %v1569_v20 = vpop.f32.mrb[35].mxu1 }
 0x354   : > { %v1760_v33 = vmul.f32 -1.442695, %v1567_v19 }
 0x355   : > { %1831 = vpow2.f32 %v1759_v18 }
 0x356   : > { %1833 = vpow2.f32 %v1760_v33 }
 0x358   : > { %v1828_v24 = vpop.eup %1827 }
 0x359   : > { %v1830_v22 = vpop.eup %1829  ;;  %v1583_v27 = vadd.f32 1.0, %v1828_v24 }
 0x35a   : > { %v1584_v34 = vadd.f32 1.0, %v1830_v22 }
 0x35b   : > { %1835 = vrcp.f32 %v1583_v27 }
 0x35c   : > { %1837 = vrcp.f32 %v1584_v34 }
 0x35f   : > { %v1832_v54 = vpop.eup %1831 }
 0x360   : > { %v1834_v35 = vpop.eup %1833  ;;  %v1585_v55 = vadd.f32 1.0, %v1832_v54 }
 0x361   : > { %v1586_v60 = vadd.f32 1.0, %v1834_v35 }
 0x362   : > { %1839 = vrcp.f32 %v1585_v55 }
 0x363   : > { %1841 = vrcp.f32 %v1586_v60 }
 0x365   : > { %v1836_v25 = vpop.eup %1835 }
 0x366   : > { %v1838_v6 = vpop.eup %1837  ;;  %1595 = vst [vmem:[%s367_s16] sm:$0xff] %v1836_v25 }
 0x367   : > { %1596 = vst [vmem:[%s367_s16 + $0x8] sm:$0xff] %v1838_v6 }
 0x36c   : > { %v1840_v59 = vpop.eup %1839 }
 0x36d   : > { %v1842_v50 = vpop.eup %1841  ;;  %1597 = vst [vmem:[%s367_s16 + $0x10] sm:$0xff] %v1840_v59 }
 0x36e   : > { %1598 = vst [vmem:[%s367_s16 + $0x18] sm:$0xff] %v1842_v50 }
 0x36f   : > { %1884 = shalt.err (!%p1881_p12)
}
 0x370   : > { %s1885_s14 = scalar_lea.hbm %s2497_s26, 512  ;;  %s1889_s20 = scalar_lea.hbm %s2548_s8, 2048 }
 0x371   : > { %p1886_p13 = scmp.ne.s32.totalorder %s2497_s26, %s1885_s14  ;;  %p1890_p2 = scmp.lt.u32.totalorder %s2497_s26, %s2548_s8 }
 0x372   : > { %p1891_p3 = scmp.lt.u32.totalorder %s1889_s20, %s1885_s14  ;;  %p1893_p6 = scmp.lt.u32.totalorder %s1885_s14, %s2497_s26 }
 0x373   : > { %p1887_p1 = pnand %p1886_p13, %p2559_p9 }
 0x374   : > { %p1892_p5 = por %p1891_p3, %p1890_p2 }
 0x375   : > { %p1888_p0 = pneg %p1887_p1 }
 0x376   : > { %p1894_p10 = por %p1893_p6, %p1892_p5 }
 0x378   : > { %p1895_p4 = pnand %p1894_p10, %p1888_p0 }
 0x37a   : > { %1898 = shalt.err (!%p1895_p4)
}
 0x37b   : > { %1771 = dma.vmem_to_hbm [thread:$0]  (%p2559_p9), %s2499_s25, 512, %s2497_s26, %s1600_s12  }
 0x37c PF: > { %p1777_p7 = scmp.ge.s32.totalorder %s1937_s30, 2  ;;  %s1626_s23 = sand.u32 1, %s1925_s27  }
 0x37d   : > { %p2560_p8 = scmp.ne.s32.totalorder %s2556_s18, 0  ;;  %s1627_s13 = scalar_lea.sflag [#allocation5], %s1626_s23 }
 0x37f   : > { %p1774_p11 = pnand %p1777_p7, %p2560_p8 }
 0x381   : > { %1920 = dma.done.wait (!%p1774_p11), %s1627_s13, 512  }
 0x382   : > { %1922 = vsyncadd (!%p1774_p11), %s1627_s13, 4294966784  ;;  %s2561_s10 = sld [smem:[#allocation9_spill]]  ;;  %p21_p12 = scmp.ge.s32.totalorder %s2012_s11, 6  }
 0x383   : > { %s2562_s27 = smov %s1929_s28  ;;  %s2563_s28 = smov %s1933_s29 }
 0x384   : > { %s2565_s30 = smov %s2012_s11  ;;  %23 = sbr.rel (!%p21_p12) target bundleno = 7 (0x7), region = 128 }
 0x388   : > { %s2564_s29 = smov %s2561_s10 }
 0x38b   :  { %1632 = vsyncpa [#allocation4], 1 }
 0x38c   :  { %1634 = vsyncpa [#allocation4 + $0x1], 1 }
 0x38d   :  { %1635 = vsyncpa [#allocation5], 1 }
 0x38e   :  { %1637 = vsyncpa [#allocation5 + $0x1], 1 }

</bundles_post_ra>
